<compile_context>
chip_gen: v7x
topology: tpu7x:2x2x1
jax: 0.10.0
libtpu: 0.0.40
codegen_flags: <defaults>
</compile_context>

<pallas_src>
import functools
import numpy as np
import jax
import jax.numpy as jnp
from jax.experimental import pallas as pl
from jax.experimental.pallas import tpu as pltpu

# ---------------- configuration (small shapes, consistent with the module) ----
NUM_CAMERAS = 16          # num_cameras
EMBED_DIM = 32            # config.embedding_dim (default 80; small here)
HIDDEN = 32               # config.mlp_hidden_units (default 100; small here)
NUM_LAYERS = 3            # config.mlp_num_layers
POSITION_NOISE_STD = 0.0
ORIENTATION_NOISE_STD = 0.01
N_INDICES = 8             # batch of camera indices passed to forward()
OUT_PAD = 128             # lane-dense output width (>= 12, multiple of 128)
TRANS_COLS = (3, 7, 11)   # translation positions in row-major flattened 3x4


# ---------------- init-time glue (plain JAX) ----------------------------------
def sinusoidal_encoding(seq_len, dim):
    position = jnp.arange(seq_len, dtype=jnp.float32)[:, None]
    div_term = jnp.exp(jnp.arange(0, dim, 2, dtype=jnp.float32) * -(jnp.log(10000.0) / dim))
    pe = jnp.zeros((seq_len, dim), dtype=jnp.float32)
    pe = pe.at[:, 0::2].set(jnp.sin(position * div_term))
    if dim % 2 == 1:
        pe = pe.at[:, -1].set(jnp.sin(jnp.squeeze(position) * 1.0))
    else:
        pe = pe.at[:, 1::2].set(jnp.cos(position * div_term))
    return pe


def _so3_terms(ang):
    """Shared SO(3) exp-map terms (matches nerfstudio lie_groups)."""
    theta2 = jnp.sum(ang * ang, axis=-1, keepdims=True)
    theta = jnp.sqrt(theta2)
    near_zero = theta < 1e-2
    theta_nz = jnp.where(near_zero, 1.0, theta)
    theta2_nz = jnp.where(near_zero, 1.0, theta2)
    sine = jnp.sin(theta)
    cosine = jnp.where(near_zero, 8.0 / (4.0 + theta2) - 1.0, jnp.cos(theta))
    sbt = jnp.where(near_zero, 0.5 * cosine + 0.5, sine / theta_nz)
    omc = jnp.where(near_zero, 0.5 * sbt, (1.0 - cosine) / theta2_nz)
    return theta, theta2, sine, cosine, sbt, omc, near_zero, theta_nz, theta2_nz


def _so3_rotation(ang):
    _, _, _, cosine, sbt, omc, _, _, _ = _so3_terms(ang)
    eye = jnp.eye(3, dtype=ang.dtype)[None]
    R = omc[..., None] * (ang[:, :, None] * ang[:, None, :]) + cosine[..., None] * eye
    t_ = sbt * ang
    z = jnp.zeros_like(t_[:, 0])
    skew = jnp.stack(
        [
            jnp.stack([z, -t_[:, 2], t_[:, 1]], axis=-1),
            jnp.stack([t_[:, 2], z, -t_[:, 0]], axis=-1),
            jnp.stack([-t_[:, 1], t_[:, 0], z], axis=-1),
        ],
        axis=1,
    )
    return R + skew


def exp_map_SO3xR3_ref(tangent):
    lin, ang = tangent[:, :3], tangent[:, 3:]
    R = _so3_rotation(ang)
    return jnp.concatenate([R, lin[:, :, None]], axis=-1)


def exp_map_SE3_ref(tangent):
    lin, ang = tangent[:, :3], tangent[:, 3:]
    theta, theta2, sine, cosine, sbt, omc, near_zero, theta_nz, theta2_nz = _so3_terms(ang)
    theta3_nz = jnp.where(near_zero, 1.0, theta * theta2)
    R = _so3_rotation(ang)
    sbt_t = jnp.where(near_zero, 1.0 - theta2 / 6.0, sine / theta_nz)
    omc_t = jnp.where(near_zero, 0.5 - theta2 / 24.0, (1.0 - cosine) / theta2_nz)
    tms_t = jnp.where(near_zero, 1.0 / 6.0 - theta2 / 120.0, (theta - sine) / theta3_nz)
    trans = (
        sbt_t * lin
        + omc_t * jnp.cross(ang, lin)
        + tms_t * ang * jnp.sum(ang * lin, axis=-1, keepdims=True)
    )
    return jnp.concatenate([R, trans[:, :, None]], axis=-1)


# ---------------- Pallas kernel: MLP -> (folded exp-map + pose compose) --------
def camera_opt_mlp_kernel(x_ref, w1_ref, b1_ref, w2_ref, b2_ref, w3_ref, b3_ref,
                          w4s_ref, b4s_ref, noise_ref, out_ref):
    # mlp_r: Linear -> ReLU -> (Linear -> ReLU) x 2   (MXU matmuls, VPU ReLU)
    x = x_ref[...]
    h = jnp.maximum(jnp.dot(x, w1_ref[...], preferred_element_type=jnp.float32) + b1_ref[...], 0.0)
    h = jnp.maximum(jnp.dot(h, w2_ref[...], preferred_element_type=jnp.float32) + b2_ref[...], 0.0)
    h = jnp.maximum(jnp.dot(h, w3_ref[...], preferred_element_type=jnp.float32) + b3_ref[...], 0.0)
    # Final Linear + exp_map_SO3xR3 + pose_utils.multiply, folded:
    #   optimize_t is hard-coded False -> ang == 0 -> the exp-map rotation is
    #   exactly the identity and its translation is r = h @ w4 + b4, so
    #     C = [B_R | B_t + r]  ==  noise_flat + h @ (w4 @ S) + b4 @ S
    #   with S scattering r into row-major flat columns 3/7/11.  S is folded
    #   into w4s/b4s at init time, and the output slab is lane-dense (128 wide,
    #   columns >= 12 are zero-padded) so the store is an unmasked vst.
    out_ref[...] = (noise_ref[...]
                    + jnp.dot(h, w4s_ref[...], preferred_element_type=jnp.float32)
                    + b4s_ref[...])


def prepare_kernel_params(params, pose_noise):
    """One-time (init) folding of the selector / noise into lane-dense slabs."""
    w1, b1, w2, b2, w3, b3, w4, b4 = params
    cols = jnp.array(TRANS_COLS, dtype=jnp.int32)
    w4s = jnp.zeros((HIDDEN, OUT_PAD), jnp.float32).at[:, cols].set(w4)   # w4 @ S, padded
    b4s = jnp.zeros((1, OUT_PAD), jnp.float32).at[:, cols].set(b4)        # b4 @ S, padded
    # Row-major flatten of the (3,4) pose slabs: (i, j) -> 4*i + j; translation
    # column j=3 lands at flat indices 3/7/11 (must match TRANS_COLS above).
    noise_flat = pose_noise.reshape(NUM_CAMERAS, 12)
    noise_pad = jnp.zeros((NUM_CAMERAS, OUT_PAD), jnp.float32).at[:, :12].set(noise_flat)
    return (w1, b1, w2, b2, w3, b3, w4s, b4s, noise_pad)


def camera_optimizer_forward(indices, embed, kernel_params):
    """Pallas implementation of CameraOptimizer.forward (mode='MLP').

    The kernel computes all NUM_CAMERAS per-camera poses once (single VMEM
    block, one grid step); duplicate ray->camera indices are resolved by a
    single cheap gather of the result instead of re-running the MLP per index.
    """
    w1, b1, w2, b2, w3, b3, w4s, b4s, noise_pad = kernel_params
    out_all = pl.pallas_call(
        camera_opt_mlp_kernel,
        out_shape=jax.ShapeDtypeStruct((NUM_CAMERAS, OUT_PAD), jnp.float32),
        grid_spec=pltpu.PrefetchScalarGridSpec(
            num_scalar_prefetch=0,
            grid=(1,),
            in_specs=[
                pl.BlockSpec((NUM_CAMERAS, EMBED_DIM), lambda i: (0, 0)),
                pl.BlockSpec((EMBED_DIM, HIDDEN), lambda i: (0, 0)),
                pl.BlockSpec((1, HIDDEN), lambda i: (0, 0)),
                pl.BlockSpec((HIDDEN, HIDDEN), lambda i: (0, 0)),
                pl.BlockSpec((1, HIDDEN), lambda i: (0, 0)),
                pl.BlockSpec((HIDDEN, HIDDEN), lambda i: (0, 0)),
                pl.BlockSpec((1, HIDDEN), lambda i: (0, 0)),
                pl.BlockSpec((HIDDEN, OUT_PAD), lambda i: (0, 0)),
                pl.BlockSpec((1, OUT_PAD), lambda i: (0, 0)),
                pl.BlockSpec((NUM_CAMERAS, OUT_PAD), lambda i: (0, 0)),
            ],
            out_specs=pl.BlockSpec((NUM_CAMERAS, OUT_PAD), lambda i: (0, 0)),
        ),
        compiler_params=pltpu.CompilerParams(dimension_semantics=("parallel",)),
    )(embed, w1, b1, w2, b2, w3, b3, w4s, b4s, noise_pad)
    # Gather per-camera results by index and reshape the row-major flat 3x4.
    # TODO(synk): for very large camera counts, move this gather in-kernel via
    # PrefetchScalarGridSpec(num_scalar_prefetch=1) + pl.Element row BlockSpecs.
    return out_all[indices, :12].reshape(indices.shape[0], 3, 4)


# ---------------- pure-JAX reference for validation ----------------------------
def reference_forward(indices, params, embed, pose_noise):
    w1, b1, w2, b2, w3, b3, w4, b4 = params
    x = embed[indices]
    h = jax.nn.relu(x @ w1 + b1)
    h = jax.nn.relu(h @ w2 + b2)
    h = jax.nn.relu(h @ w3 + b3)
    r = h @ w4 + b4
    t = jnp.zeros_like(r)                 # optimize_t == False in forward()
    A = exp_map_SO3xR3_ref(jnp.concatenate([r, t], axis=-1))
    B = pose_noise[indices]
    R = A[..., :3] @ B[..., :3]
    tv = A[..., :3] @ B[..., 3:4] + A[..., 3:4]
    return jnp.concatenate([R, tv], axis=-1)


# ---------------- parameter construction (deterministic, in-script) ------------
def init_params(key):
    def linear(k, fan_in, fan_out):
        kw, kb = jax.random.split(k)
        bound = 1.0 / np.sqrt(fan_in)
        w = jax.random.uniform(kw, (fan_in, fan_out), jnp.float32, -bound, bound)
        b = jax.random.uniform(kb, (1, fan_out), jnp.float32, -bound, bound)
        return w, b

    k1, k2, k3, k4, kn = jax.random.split(key, 5)
    w1, b1 = linear(k1, EMBED_DIM, HIDDEN)
    w2, b2 = linear(k2, HIDDEN, HIDDEN)
    w3, b3 = linear(k3, HIDDEN, HIDDEN)
    w4, b4 = linear(k4, HIDDEN, 3)
    params = (w1, b1, w2, b2, w3, b3, w4, b4)
    # TODO(synk): mlp_t weights exist in the module but are dead code in forward
    # (optimize_t is hard-coded False), so they are not materialized here.

    embed = sinusoidal_encoding(NUM_CAMERAS, EMBED_DIM)

    std_vector = jnp.array([POSITION_NOISE_STD] * 3 + [ORIENTATION_NOISE_STD] * 3,
                           dtype=jnp.float32)
    noise_tangent = jax.random.normal(kn, (NUM_CAMERAS, 6), jnp.float32) * std_vector
    pose_noise = exp_map_SE3_ref(noise_tangent)        # (NUM_CAMERAS, 3, 4)
    return params, embed, pose_noise


if __name__ == "__main__":
    key = jax.random.PRNGKey(0)
    kp, ki = jax.random.split(key)
    params, embed, pose_noise = init_params(kp)
    kernel_params = prepare_kernel_params(params, pose_noise)   # init-time folding

    indices = jax.random.randint(ki, (N_INDICES,), 0, NUM_CAMERAS, dtype=jnp.int32)

    fwd = jax.jit(camera_optimizer_forward)
    out = jax.block_until_ready(fwd(indices, embed, kernel_params))

    ref = jax.block_until_ready(reference_forward(indices, params, embed, pose_noise))

    assert out.shape == (N_INDICES, 3, 4) and out.dtype == jnp.float32
    # Tightened tolerance: post-MLP math is now exact (identity rotation fold);
    # only MXU-vs-XLA matmul accumulation differences remain.
    np.testing.assert_allclose(np.asarray(out), np.asarray(ref), rtol=2e-3, atol=1e-3)
    print("KERNEL_OK")
</pallas_src>

<mosaic_0001>
module attributes {stable_mosaic.version = 11 : i64} {
  func.func @camera_opt_mlp_kernel(%arg0: i32, %arg1: memref<16x32xf32, #tpu.memory_space<vmem>>, %arg2: memref<32x32xf32, #tpu.memory_space<vmem>>, %arg3: memref<1x32xf32, #tpu.memory_space<vmem>>, %arg4: memref<32x32xf32, #tpu.memory_space<vmem>>, %arg5: memref<1x32xf32, #tpu.memory_space<vmem>>, %arg6: memref<32x32xf32, #tpu.memory_space<vmem>>, %arg7: memref<1x32xf32, #tpu.memory_space<vmem>>, %arg8: memref<32x128xf32, #tpu.memory_space<vmem>>, %arg9: memref<1x128xf32, #tpu.memory_space<vmem>>, %arg10: memref<16x128xf32, #tpu.memory_space<vmem>>, %arg11: memref<16x128xf32, #tpu.memory_space<vmem>>) attributes {dimension_semantics = [#tpu.dimension_semantics<parallel>], iteration_bounds = array<i64: 1>, scalar_prefetch = 0 : i64, scratch_operands = 0 : i64, tpu.core_type = #tpu.core_type<tc>, window_params = [{pipeline_mode = #tpu.pipeline_mode<synchronous>, transform_indices = @transform_0, window_bounds = array<i64: 16, 32>}, {pipeline_mode = #tpu.pipeline_mode<synchronous>, transform_indices = @transform_1, window_bounds = array<i64: 32, 32>}, {pipeline_mode = #tpu.pipeline_mode<synchronous>, transform_indices = @transform_2, window_bounds = array<i64: 1, 32>}, {pipeline_mode = #tpu.pipeline_mode<synchronous>, transform_indices = @transform_3, window_bounds = array<i64: 32, 32>}, {pipeline_mode = #tpu.pipeline_mode<synchronous>, transform_indices = @transform_4, window_bounds = array<i64: 1, 32>}, {pipeline_mode = #tpu.pipeline_mode<synchronous>, transform_indices = @transform_5, window_bounds = array<i64: 32, 32>}, {pipeline_mode = #tpu.pipeline_mode<synchronous>, transform_indices = @transform_6, window_bounds = array<i64: 1, 32>}, {pipeline_mode = #tpu.pipeline_mode<synchronous>, transform_indices = @transform_7, window_bounds = array<i64: 32, 128>}, {pipeline_mode = #tpu.pipeline_mode<synchronous>, transform_indices = @transform_8, window_bounds = array<i64: 1, 128>}, {pipeline_mode = #tpu.pipeline_mode<synchronous>, transform_indices = @transform_9, window_bounds = array<i64: 16, 128>}, {pipeline_mode = #tpu.pipeline_mode<synchronous>, transform_indices = @transform_10, window_bounds = array<i64: 16, 128>}]} {
    %c0 = arith.constant 0 : index
    %c0_0 = arith.constant 0 : index
    %0 = vector.load %arg1[%c0, %c0_0] : memref<16x32xf32, #tpu.memory_space<vmem>>, vector<16x32xf32>
    %c0_1 = arith.constant 0 : index
    %c0_2 = arith.constant 0 : index
    %1 = vector.load %arg2[%c0_1, %c0_2] : memref<32x32xf32, #tpu.memory_space<vmem>>, vector<32x32xf32>
    %cst = arith.constant dense<0.000000e+00> : vector<16x32xf32>
    %2 = tpu.matmul %0, %1, %cst {dimension_numbers = #tpu.dot_dimension_numbers<[1], [0], [0], [1], [0, 0, 1, 1], [], []>} : vector<16x32xf32>, vector<32x32xf32>, vector<16x32xf32> -> vector<16x32xf32>
    %c0_3 = arith.constant 0 : index
    %c0_4 = arith.constant 0 : index
    %3 = vector.load %arg3[%c0_3, %c0_4] : memref<1x32xf32, #tpu.memory_space<vmem>>, vector<1x32xf32>
    %4 = vector.broadcast %3 : vector<1x32xf32> to vector<16x32xf32>
    %5 = arith.addf %2, %4 : vector<16x32xf32>
    %cst_5 = arith.constant 0.000000e+00 : f32
    %6 = vector.broadcast %cst_5 : f32 to vector<16x32xf32>
    %7 = arith.maximumf %5, %6 : vector<16x32xf32>
    %c0_6 = arith.constant 0 : index
    %c0_7 = arith.constant 0 : index
    %8 = vector.load %arg4[%c0_6, %c0_7] : memref<32x32xf32, #tpu.memory_space<vmem>>, vector<32x32xf32>
    %cst_8 = arith.constant dense<0.000000e+00> : vector<16x32xf32>
    %9 = tpu.matmul %7, %8, %cst_8 {dimension_numbers = #tpu.dot_dimension_numbers<[1], [0], [0], [1], [0, 0, 1, 1], [], []>} : vector<16x32xf32>, vector<32x32xf32>, vector<16x32xf32> -> vector<16x32xf32>
    %c0_9 = arith.constant 0 : index
    %c0_10 = arith.constant 0 : index
    %10 = vector.load %arg5[%c0_9, %c0_10] : memref<1x32xf32, #tpu.memory_space<vmem>>, vector<1x32xf32>
    %11 = vector.broadcast %10 : vector<1x32xf32> to vector<16x32xf32>
    %12 = arith.addf %9, %11 : vector<16x32xf32>
    %cst_11 = arith.constant 0.000000e+00 : f32
    %13 = vector.broadcast %cst_11 : f32 to vector<16x32xf32>
    %14 = arith.maximumf %12, %13 : vector<16x32xf32>
    %c0_12 = arith.constant 0 : index
    %c0_13 = arith.constant 0 : index
    %15 = vector.load %arg6[%c0_12, %c0_13] : memref<32x32xf32, #tpu.memory_space<vmem>>, vector<32x32xf32>
    %cst_14 = arith.constant dense<0.000000e+00> : vector<16x32xf32>
    %16 = tpu.matmul %14, %15, %cst_14 {dimension_numbers = #tpu.dot_dimension_numbers<[1], [0], [0], [1], [0, 0, 1, 1], [], []>} : vector<16x32xf32>, vector<32x32xf32>, vector<16x32xf32> -> vector<16x32xf32>
    %c0_15 = arith.constant 0 : index
    %c0_16 = arith.constant 0 : index
    %17 = vector.load %arg7[%c0_15, %c0_16] : memref<1x32xf32, #tpu.memory_space<vmem>>, vector<1x32xf32>
    %18 = vector.broadcast %17 : vector<1x32xf32> to vector<16x32xf32>
    %19 = arith.addf %16, %18 : vector<16x32xf32>
    %cst_17 = arith.constant 0.000000e+00 : f32
    %20 = vector.broadcast %cst_17 : f32 to vector<16x32xf32>
    %21 = arith.maximumf %19, %20 : vector<16x32xf32>
    %c0_18 = arith.constant 0 : index
    %c0_19 = arith.constant 0 : index
    %22 = vector.load %arg10[%c0_18, %c0_19] : memref<16x128xf32, #tpu.memory_space<vmem>>, vector<16x128xf32>
    %c0_20 = arith.constant 0 : index
    %c0_21 = arith.constant 0 : index
    %23 = vector.load %arg8[%c0_20, %c0_21] : memref<32x128xf32, #tpu.memory_space<vmem>>, vector<32x128xf32>
    %cst_22 = arith.constant dense<0.000000e+00> : vector<16x128xf32>
    %24 = tpu.matmul %21, %23, %cst_22 {dimension_numbers = #tpu.dot_dimension_numbers<[1], [0], [0], [1], [0, 0, 1, 1], [], []>} : vector<16x32xf32>, vector<32x128xf32>, vector<16x128xf32> -> vector<16x128xf32>
    %25 = arith.addf %22, %24 : vector<16x128xf32>
    %c0_23 = arith.constant 0 : index
    %c0_24 = arith.constant 0 : index
    %26 = vector.load %arg9[%c0_23, %c0_24] : memref<1x128xf32, #tpu.memory_space<vmem>>, vector<1x128xf32>
    %27 = vector.broadcast %26 : vector<1x128xf32> to vector<16x128xf32>
    %28 = arith.addf %25, %27 : vector<16x128xf32>
    %c0_25 = arith.constant 0 : index
    %c0_26 = arith.constant 0 : index
    %29 = vector.load %arg11[%c0_25, %c0_26] : memref<16x128xf32, #tpu.memory_space<vmem>>, vector<16x128xf32>
    tpu.vector_store %arg11[%c0_25, %c0_26], %28 {strides = array<i32>} : memref<16x128xf32, #tpu.memory_space<vmem>>, vector<16x128xf32>,
    return
  }
  func.func @transform_0(%arg0: i32) -> (i32, i32) {
    %c0_i32 = arith.constant 0 : i32
    %c0_i32_0 = arith.constant 0 : i32
    %c0_i32_1 = arith.constant 0 : i32
    return %c0_i32, %c0_i32_0 : i32, i32
  }
  func.func @transform_1(%arg0: i32) -> (i32, i32) {
    %c0_i32 = arith.constant 0 : i32
    %c0_i32_0 = arith.constant 0 : i32
    %c0_i32_1 = arith.constant 0 : i32
    return %c0_i32, %c0_i32_0 : i32, i32
  }
  func.func @transform_2(%arg0: i32) -> (i32, i32) {
    %c0_i32 = arith.constant 0 : i32
    %c0_i32_0 = arith.constant 0 : i32
    %c0_i32_1 = arith.constant 0 : i32
    return %c0_i32, %c0_i32_0 : i32, i32
  }
  func.func @transform_3(%arg0: i32) -> (i32, i32) {
    %c0_i32 = arith.constant 0 : i32
    %c0_i32_0 = arith.constant 0 : i32
    %c0_i32_1 = arith.constant 0 : i32
    return %c0_i32, %c0_i32_0 : i32, i32
  }
  func.func @transform_4(%arg0: i32) -> (i32, i32) {
    %c0_i32 = arith.constant 0 : i32
    %c0_i32_0 = arith.constant 0 : i32
    %c0_i32_1 = arith.constant 0 : i32
    return %c0_i32, %c0_i32_0 : i32, i32
  }
  func.func @transform_5(%arg0: i32) -> (i32, i32) {
    %c0_i32 = arith.constant 0 : i32
    %c0_i32_0 = arith.constant 0 : i32
    %c0_i32_1 = arith.constant 0 : i32
    return %c0_i32, %c0_i32_0 : i32, i32
  }
  func.func @transform_6(%arg0: i32) -> (i32, i32) {
    %c0_i32 = arith.constant 0 : i32
    %c0_i32_0 = arith.constant 0 : i32
    %c0_i32_1 = arith.constant 0 : i32
    return %c0_i32, %c0_i32_0 : i32, i32
  }
  func.func @transform_7(%arg0: i32) -> (i32, i32) {
    %c0_i32 = arith.constant 0 : i32
    %c0_i32_0 = arith.constant 0 : i32
    %c0_i32_1 = arith.constant 0 : i32
    return %c0_i32, %c0_i32_0 : i32, i32
  }
  func.func @transform_8(%arg0: i32) -> (i32, i32) {
    %c0_i32 = arith.constant 0 : i32
    %c0_i32_0 = arith.constant 0 : i32
    %c0_i32_1 = arith.constant 0 : i32
    return %c0_i32, %c0_i32_0 : i32, i32
  }
  func.func @transform_9(%arg0: i32) -> (i32, i32) {
    %c0_i32 = arith.constant 0 : i32
    %c0_i32_0 = arith.constant 0 : i32
    %c0_i32_1 = arith.constant 0 : i32
    return %c0_i32, %c0_i32_0 : i32, i32
  }
  func.func @transform_10(%arg0: i32) -> (i32, i32) {
    %c0_i32 = arith.constant 0 : i32
    %c0_i32_0 = arith.constant 0 : i32
    %c0_i32_1 = arith.constant 0 : i32
    return %c0_i32, %c0_i32_0 : i32, i32
  }
}

</mosaic_0001>

<bundles_post_ra>
// kernel: custom-call
= control target key start
LH: loop header
LB: loop body
LE: loop exit
PB: predicated region body
PF: predicated region fallthrough
CT: control target
= control target key end

     0   :  { %s6_s0 = inlined_call_operand.vmem [shape: f32[8,12], index: 0, kind: output, shape index: {}]  }

// kernel: camera_optimizer_forward.1
= control target key start
LH: loop header
LB: loop body
LE: loop exit
PB: predicated region body
PF: predicated region fallthrough
CT: control target
= control target key end

     0   :  { %15 = vsyncpa [#allocation3], 0  ;;  %s879_s0 = inlined_call_operand.hbm [shape: f32[16,32], index: 0, kind: input, shape index: {}]   ;;  %s880_s1 = inlined_call_operand.vmem [shape: f32[32,32], index: 1, kind: input, shape index: {}]   ;;  %s881_s2 = inlined_call_operand.vmem [shape: f32[1,32], index: 2, kind: input, shape index: {}]   ;;  %s882_s3 = inlined_call_operand.hbm [shape: f32[32,32], index: 3, kind: input, shape index: {}]   ;;  %s883_s4 = inlined_call_operand.vmem [shape: f32[1,32], index: 4, kind: input, shape index: {}]   ;;  %s884_s5 = inlined_call_operand.hbm [shape: f32[32,32], index: 5, kind: input, shape index: {}]   ;;  %s885_s6 = inlined_call_operand.vmem [shape: f32[1,32], index: 6, kind: input, shape index: {}]   ;;  %s886_s7 = inlined_call_operand.vmem [shape: f32[32,128], index: 7, kind: input, shape index: {}]   ;;  %s887_s8 = inlined_call_operand.vmem [shape: f32[1,128], index: 8, kind: input, shape index: {}]   ;;  %s888_s9 = inlined_call_operand.hbm [shape: f32[16,128], index: 9, kind: input, shape index: {}]   ;;  %s889_s10 = inlined_call_operand.vmem [shape: f32[16,128], index: 10, kind: output, shape index: {}]  }
   0x1   :  { %16 = vsyncpa [#allocation5], 0 }
   0x2   :  { %17 = vsyncpa [#allocation8], 0  ;;  %s694_s13 = smov [#allocation4]   ;;  %s695_s15 = smov [#allocation2]  }
   0x3   :  { %s39_s14 = sshll.u32 %s694_s13, 4  ;;  %s23_s16 = sshll.u32 %s695_s15, 4  ;;  %s40_s14 = int_to_ptr.vmem [resolvable:$true] %s39_s14  ;;  %s755_s16 = int_to_ptr.vmem [resolvable:$true] %s23_s16 }
   0x4   :  { %s600_s19 = scalar_lea.hbm %s882_s3, 512 }
   0x5   :  { %p601_p0 = scmp.ne.s32.totalorder %s882_s3, %s600_s19  ;;  %p604_p1 = scmp.lt.u32.totalorder %s600_s19, %s882_s3 }
   0x7   :  { %p606_p2 = pnand %p604_p1, %p601_p0 }
   0x9   :  { %609 = shalt.err (!%p606_p2)
}
   0xa   :  { %s610_s24 = scalar_lea.vmem %s40_s14, 512  ;;  %p615_p4 = scmp.lt.s32.totalorder %s40_s14, %s40_s14 }
   0xb   :  { %p611_p3 = scmp.ne.s32.totalorder %s40_s14, %s610_s24  ;;  %p616_p5 = scmp.lt.s32.totalorder %s610_s24, %s610_s24 }
   0xd   :  { %p617_p6 = por %p616_p5, %p615_p4 }
   0xf   :  { %p618_p7 = pnand %p617_p6, %p611_p3 }
  0x11   :  { %621 = shalt.err (!%p618_p7)
}
  0x12   :  { %s696_s25 = smov 128   ;;  %s697_s26 = smov 8  }
  0x13   :  { %45 = dma.hbm_to_vmem [thread:$0]  %s882_s3, 512, %s40_s14, [#allocation5], %s696_s25, %s696_s25, %s697_s26  }
  0x14   :  { %s622_s11 = scalar_lea.hbm %s879_s0, 256 }
  0x15   :  { %p623_p8 = scmp.ne.s32.totalorder %s879_s0, %s622_s11  ;;  %p626_p9 = scmp.lt.u32.totalorder %s622_s11, %s879_s0 }
  0x17   :  { %p628_p10 = pnand %p626_p9, %p623_p8 }
  0x19   :  { %631 = shalt.err (!%p628_p10)
}
  0x1a   :  { %s632_s18 = scalar_lea.vmem %s755_s16, 256  ;;  %p637_p12 = scmp.lt.s32.totalorder %s755_s16, %s755_s16 }
  0x1b   :  { %p633_p11 = scmp.ne.s32.totalorder %s755_s16, %s632_s18  ;;  %p638_p13 = scmp.lt.s32.totalorder %s632_s18, %s632_s18 }
  0x1d   :  { %p639_p0 = por %p638_p13, %p637_p12 }
  0x1f   :  { %p640_p1 = pnand %p639_p0, %p633_p11 }
  0x21   :  { %643 = shalt.err (!%p640_p1)
}
  0x22   :  { %29 = dma.hbm_to_vmem [thread:$0]  %s879_s0, 256, %s755_s16, [#allocation3], %s696_s25, %s696_s25, %s697_s26  }
  0x23   :  { %s698_s19 = smov [#allocation6]   ;;  %s699_s21 = smov [#allocation7]  }
  0x24   :  { %s53_s20 = sshll.u32 %s698_s19, 4  ;;  %s71_s22 = sshll.u32 %s699_s21, 4  ;;  %s54_s20 = int_to_ptr.vmem [resolvable:$true] %s53_s20  ;;  %s792_s22 = int_to_ptr.vmem [resolvable:$true] %s71_s22 }
  0x25   :  { %s644_s27 = scalar_lea.hbm %s884_s5, 512 }
  0x26   :  { %p645_p2 = scmp.ne.s32.totalorder %s884_s5, %s644_s27  ;;  %p648_p3 = scmp.lt.u32.totalorder %s644_s27, %s884_s5 }
  0x28   :  { %p650_p4 = pnand %p648_p3, %p645_p2 }
  0x2a   :  { %653 = shalt.err (!%p650_p4)
}
  0x2b   :  { %s654_s0 = scalar_lea.vmem %s54_s20, 512  ;;  %p659_p6 = scmp.lt.s32.totalorder %s54_s20, %s54_s20 }
  0x2c   :  { %p655_p5 = scmp.ne.s32.totalorder %s54_s20, %s654_s0  ;;  %p660_p7 = scmp.lt.s32.totalorder %s654_s0, %s654_s0 }
  0x2e   :  { %p661_p8 = por %p660_p7, %p659_p6 }
  0x30   :  { %p662_p9 = pnand %p661_p8, %p655_p5 }
  0x32   :  { %665 = shalt.err (!%p662_p9)
}
  0x33   :  { %59 = dma.hbm_to_vmem [thread:$0]  %s884_s5, 512, %s54_s20, [#allocation5], %s696_s25, %s696_s25, %s697_s26  }
  0x34   :  { %s666_s17 = scalar_lea.hbm %s888_s9, 256 }
  0x35   :  { %p667_p10 = scmp.ne.s32.totalorder %s888_s9, %s666_s17  ;;  %p670_p11 = scmp.lt.u32.totalorder %s666_s17, %s888_s9 }
  0x37   :  { %p672_p12 = pnand %p670_p11, %p667_p10 }
  0x39   :  { %675 = shalt.err (!%p672_p12)
}
  0x3a   :  { %s676_s21 = scalar_lea.vmem %s792_s22, 256  ;;  %p681_p0 = scmp.lt.s32.totalorder %s792_s22, %s792_s22 }
  0x3b   :  { %p677_p13 = scmp.ne.s32.totalorder %s792_s22, %s676_s21  ;;  %p682_p1 = scmp.lt.s32.totalorder %s676_s21, %s676_s21 }
  0x3d   :  { %p683_p2 = por %p682_p1, %p681_p0 }
  0x3f   :  { %p684_p3 = pnand %p683_p2, %p677_p13 }
  0x41   :  { %687 = shalt.err (!%p684_p3)
}
  0x42   :  { %77 = dma.hbm_to_vmem [thread:$0]  %s888_s9, 256, %s792_s22, [#allocation8], %s696_s25, %s696_s25, %s697_s26  }
  0x43   :  { %688 = dma.done.wait [#allocation3], 256  }
  0x44   :  { %689 = vsyncadd [#allocation3], 4294967040 }
  0x45   :  { %690 = dma.done.wait [#allocation5], 1024  }
  0x46   :  { %691 = vsyncadd [#allocation5], 4294966272 }
  0x47   :  { %692 = dma.done.wait [#allocation8], 256  }
  0x48   :  { %693 = vsyncadd [#allocation8], 4294967040  ;;  %vm103_vm0 = vcmask 261120   ;;  %v92_v0 = vld [vmem:[%s880_s1] sm:$0xff]  ;;  %v93_v1 = vld [vmem:[%s880_s1 + $0x8] sm:$0xff] }
  0x49   :  { %v94_v2 = vld [vmem:[%s880_s1 + $0x10] sm:$0xff]  ;;  %v562_v3 = vpack.c.bf16 %v93_v1, %v92_v0  ;;  %v95_v4 = vld [vmem:[%s880_s1 + $0x18] sm:$0xff]  ;;  %v90_v5 = vld [vmem:[#allocation2] sm:$0xff] }
  0x4a   :  { %v566_v6 = vpack.c.bf16 %v95_v4, %v94_v2  ;;  %526 = vmatprep.mubr.msk.f32.mxu0 %vm103_vm0, %v90_v5  ;;  %v187_v7 = vld [vmem:[#allocation4] sm:$0xff]  ;;  %v188_v8 = vld [vmem:[#allocation4 + $0x8] sm:$0xff]  ;;  %v91_v10 = vld [vmem:[#allocation2 + $0x8] sm:$0xff] }
  0x4b   :  { %563 = vmatprep.subr.bf16.mxu0 %v562_v3  ;;  %v570_v9 = vpack.c.bf16 %v188_v8, %v187_v7  ;;  %v189_v11 = vld [vmem:[#allocation4 + $0x10] sm:$0xff]  ;;  %v190_v12 = vld [vmem:[#allocation4 + $0x18] sm:$0xff]  ;;  %v281_v14 = vld [vmem:[#allocation6] sm:$0xff] }
  0x4c   :  { %565 = vmatpush3.bf16.msra.mxu0 %v562_v3  ;;  %v574_v13 = vpack.c.bf16 %v190_v12, %v189_v11  ;;  %v282_v15 = vld [vmem:[#allocation6 + $0x8] sm:$0xff]  ;;  %v482_v17 = vld [vmem:[%s881_s2] ss:$0 sm:$0xff]  ;;  %v284_v25 = vld [vmem:[#allocation6 + $0x18] sm:$0xff] }
  0x4d   :  { %567 = vmatprep.subr.bf16.mxu0 %v566_v6  ;;  %571 = vmatprep.subr.bf16.mxu1 %v570_v9  ;;  %v578_v16 = vpack.c.bf16 %v282_v15, %v281_v14  ;;  %v283_v24 = vld [vmem:[#allocation6 + $0x10] sm:$0xff]  ;;  %v378_v28 = vld [vmem:[%s886_s7 + $0x8] sm:$0xff]  ;;  %v379_v37 = vld [vmem:[%s886_s7 + $0x10] sm:$0xff] }
  0x4e   :  { %573 = vmatpush3.bf16.msra.mxu1 %v570_v9  ;;  %v582_v26 = vpack.c.bf16 %v284_v25, %v283_v24  ;;  %v377_v27 = vld [vmem:[%s886_s7] sm:$0xff]  ;;  %v380_v38 = vld [vmem:[%s886_s7 + $0x18] sm:$0xff]  ;;  %v375_v48 = vld [vmem:[#allocation7] sm:$0xff] }
  0x4f   :  { %575 = vmatprep.subr.bf16.mxu1 %v574_v13  ;;  %v586_v29 = vpack.c.bf16 %v378_v28, %v377_v27  ;;  %v485_v30 = vld [vmem:[%s883_s4] ss:$0 sm:$0xff]  ;;  %v590_v39 = vpack.c.bf16 %v380_v38, %v379_v37  ;;  %v376_v47 = vld [vmem:[#allocation7 + $0x8] sm:$0xff] }
  0x50   :  { %569 = vmatpush3.bf16.msra.mxu0 %v566_v6  ;;  %v488_v40 = vld [vmem:[%s885_s6] ss:$0 sm:$0xff] }
  0x51   :  { %579 = vmatprep.subr.bf16.mxu0 %v578_v16  ;;  %v493_v50 = vld [vmem:[%s887_s8] ss:$0 sm:$0xff] }
  0x52   :  { %577 = vmatpush3.bf16.msra.mxu1 %v574_v13 }
  0x53   :  { %527 = vmatmul.mubr.msk.f32.vlgmr.msra.gmra.mrb[0].mxu0 %vm103_vm0, %v91_v10  ;;  %587 = vmatprep.subr.bf16.mxu1 %v586_v29 }
  0x54   :  { %581 = vmatpush3.bf16.msra.mxu0 %v578_v16 }
  0x55   :  { %583 = vmatprep.subr.bf16.mxu0 %v582_v26 }
  0x58   :  { %585 = vmatpush3.bf16.msra.mxu0 %v582_v26 }
 0x126   :  { %v528_v18 = vpop.f32.mrb[0].mxu0 }
 0x127   :  { %v182_v19 = vadd.f32 %v528_v18, %v482_v17  ;;  %v176_v20 = vpop.f32.mrb[1].mxu0 }
 0x128   :  { %v177_v21 = vadd.f32 %v482_v17, %v176_v20 }
 0x129   :  { %v186_v23 = vmax.f32 %v182_v19, 0.0 }
 0x12a   :  { %v185_v22 = vmax.f32 %v177_v21, 0.0 }
 0x12c   :  { %537 = vmatprep.mubr.msk.f32.mxu1 %vm103_vm0, %v185_v22 }
 0x12d   :  { %538 = vmatmul.mubr.msk.f32.vlgmr.msra.gmra.mrb[0].mxu1 %vm103_vm0, %v186_v23 }
 0x12e   :  { %589 = vmatpush3.bf16.msra.mxu1 %v586_v29 }
 0x12f   :  { %591 = vmatprep.subr.bf16.mxu1 %v590_v39 }
 0x132   :  { %593 = vmatpush3.bf16.msra.mxu1 %v590_v39 }
 0x200   :  { %v539_v31 = vpop.f32.mrb[0].mxu1 }
 0x201   :  { %v276_v32 = vadd.f32 %v539_v31, %v485_v30  ;;  %v270_v33 = vpop.f32.mrb[1].mxu1 }
 0x202   :  { %v271_v34 = vadd.f32 %v485_v30, %v270_v33 }
 0x203   :  { %v280_v36 = vmax.f32 %v276_v32, 0.0 }
 0x204   :  { %v279_v35 = vmax.f32 %v271_v34, 0.0 }
 0x206   :  { %548 = vmatprep.mubr.msk.f32.mxu0 %vm103_vm0, %v279_v35 }
 0x207   :  { %549 = vmatmul.mubr.msk.f32.vlgmr.msra.gmra.mrb[2].mxu0 %vm103_vm0, %v280_v36 }
 0x2da   :  { %v550_v41 = vpop.f32.mrb[2].mxu0 }
 0x2db   :  { %v370_v42 = vadd.f32 %v550_v41, %v488_v40  ;;  %v364_v43 = vpop.f32.mrb[3].mxu0 }
 0x2dc   :  { %v365_v44 = vadd.f32 %v488_v40, %v364_v43 }
 0x2dd   :  { %v374_v46 = vmax.f32 %v370_v42, 0.0 }
 0x2de   :  { %v373_v45 = vmax.f32 %v365_v44, 0.0 }
 0x2e0   :  { %559 = vmatprep.mubr.msk.f32.mxu1 %vm103_vm0, %v373_v45 }
 0x2e1   :  { %560 = vmatmul.mubr.msk.f32.vlgmr.msra.gmra.mrb[2].mxu1 %vm103_vm0, %v374_v46 }
 0x3b4   :  { %v561_v49 = vpop.f32.mrb[2].mxu1 }
 0x3b5   :  { %v463_v51 = vadd.f32 %v561_v49, %v376_v47  ;;  %v453_v52 = vpop.f32.mrb[3].mxu1 }
 0x3b6   :  { %v462_v53 = vadd.f32 %v453_v52, %v375_v48 }
 0x3b7   :  { %v472_v54 = vadd.f32 %v493_v50, %v463_v51 }
 0x3b8   :  { %v471_v55 = vadd.f32 %v493_v50, %v462_v53 }
 0x3b9   :  { %474 = vst [vmem:[%s889_s10 + $0x8] sm:$0xff] %v472_v54 }
 0x3ba   :  { %473 = vst [vmem:[%s889_s10] sm:$0xff] %v471_v55 }
 0x3bb   :  { %479 = vsyncpa [#allocation3], 1 }
 0x3bc   :  { %480 = vsyncpa [#allocation5], 1 }
 0x3bd   :  { %481 = vsyncpa [#allocation8], 1 }

</bundles_post_ra>
